<compile_context>
chip_gen: v5e
topology: v5e:2x2
jax: 0.10.0
libtpu: 0.0.40
codegen_flags: <defaults>
</compile_context>

<pallas_src>
import functools

import jax
import jax.numpy as jnp
import numpy as np
from jax import lax
from jax.experimental import pallas as pl
from jax.experimental.pallas import tpu as pltpu


def _reduce_kernel(hc, tile, bps, n_valid, need_mask, has_bias,
                   x_ref, w_ref, b_ref,
                   kvs_ref, ksum_ref, qsq_ref, ksq_ref):
    c = pl.program_id(0)          # shard (TensorCore) axis
    i = pl.program_id(1)          # row-block axis (reduction)

    x = x_ref[...]
    # Fused projection: single (tile, C) x (C, 3*hc) matmul -> [q | v | k].
    qvk = jnp.dot(x, w_ref[...], preferred_element_type=jnp.float32)
    if has_bias:                  # static python flag
        qvk = qvk + b_ref[...]
    q = qvk[:, :hc]
    v = qvk[:, hc:2 * hc]
    k = qvk[:, 2 * hc:]

    if need_mask:                 # static python flag: ragged tail / shard overshoot
        blk = c * bps + i         # un-clamped global block index
        row = blk * tile + lax.broadcasted_iota(jnp.int32, (tile, 1), 0)
        valid = row < n_valid
        # jnp.where (select), NOT multiply: partial-block contents are
        # undefined and may be NaN/Inf; 0 * NaN would poison the reductions.
        q = jnp.where(valid, q, 0.0)
        k = jnp.where(valid, k, 0.0)
        v = jnp.where(valid, v, 0.0)

    @pl.when(i == 0)
    def _():
        kvs_ref[...] = jnp.zeros_like(kvs_ref)
        ksum_ref[...] = jnp.zeros_like(ksum_ref)
        qsq_ref[...] = jnp.zeros_like(qsq_ref)
        ksq_ref[...] = jnp.zeros_like(ksq_ref)

    # k^T v: contract over the row dimension directly on the MXU
    # (no explicit transpose through the XLU).
    kvs_ref[...] += lax.dot_general(
        k, v, dimension_numbers=(((0,), (0,)), ((), ())),
        preferred_element_type=jnp.float32)
    ksum_ref[...] += jnp.sum(k, axis=0, keepdims=True)
    # Per-lane partial sums; the final scalar reduce happens once in the wrapper.
    qsq_ref[...] += jnp.sum(q * q, axis=0, keepdims=True)
    ksq_ref[...] += jnp.sum(k * k, axis=0, keepdims=True)


def _output_kernel(hc, n_total, has_bias,
                   x_ref, w_ref, b_ref,
                   kvs_ref, ksum_ref,
                   o_ref):
    # Recompute q and v (cheap: K = C is small) instead of re-reading them
    # from HBM: single fused (tile, C) x (C, 2*hc) matmul -> [q | v].
    qv = jnp.dot(x_ref[...], w_ref[...], preferred_element_type=jnp.float32)
    if has_bias:
        qv = qv + b_ref[...]
    q = qv[:, :hc]
    v = qv[:, hc:]

    # kvs_ref / ksum_ref already carry the 1/(||q||_F * ||k||_F) scaling.
    num = jnp.dot(q, kvs_ref[...], preferred_element_type=jnp.float32) + n_total * v
    denom = jnp.sum(q * ksum_ref[...], axis=-1, keepdims=True) + n_total
    o_ref[...] = num * (1.0 / denom)     # (tile,1) reciprocal, not (tile,hc) divide


def sgformer_attention(x, wq, wk, wv, bq, bk, bv, *, head_channels,
                       tile_n=16384, num_shards=2, qkv_bias=True):
    N, C = x.shape
    hc = head_channels
    f32 = jnp.float32

    # Fused projection weights. Pass 1 uses all three ([q | v | k]);
    # pass 2 uses only the leading [q | v] columns.
    w_qvk = jnp.concatenate([wq, wv, wk], axis=1).astype(f32)   # (C, 3*hc)
    b_qvk = jnp.concatenate([bq, bv, bk], axis=1).astype(f32)   # (1, 3*hc)
    w_qv = w_qvk[:, :2 * hc]
    b_qv = b_qvk[:, :2 * hc]

    x_f = x if x.dtype == f32 else x.astype(f32)

    # Row tile: as large as possible (amortize ~0.35us per-grid-step overhead)
    # while keeping the double-buffered pass-2 working set (x tile + out tile)
    # inside ~40 MiB — safe under v7x's 64 MiB physical VMEM; v5e/v6e have 128.
    vmem_budget = 40 * 1024 * 1024
    row_bytes = (C + hc) * 4 * 2                     # double-buffered x + out
    tile_cap = max(8, (vmem_budget // row_bytes) // 8 * 8)
    tile = max(8, (min(tile_n, tile_cap) // 8) * 8)
    if N <= tile:
        tile = N                                     # single full-extent block

    nblk = -(-N // tile)                             # cdiv
    shards = max(1, min(num_shards, nblk))           # pass-1 core shards
    bps = -(-nblk // shards)                         # blocks per shard
    need_mask = (shards * bps * tile) != N           # ragged tail or overshoot
    need_clamp = (shards * bps) > nblk               # overshoot blocks exist

    est = tile * row_bytes + (4 * C * hc + hc * hc + 8 * hc) * 4
    vmem_limit = int(min(48 * 1024 * 1024, max(32 * 1024 * 1024, est + (4 << 20))))

    if need_clamp:
        # Overshoot grid steps re-read a valid block; their rows are masked out.
        x1_map = lambda c, i: (jnp.minimum(c * bps + i, nblk - 1), 0)
    else:
        x1_map = lambda c, i: (c * bps + i, 0)

    def full1(shape):            # pass-1 (2-D grid) replicated block
        return pl.BlockSpec(shape, lambda c, i: (0, 0))

    def acc1(shape):             # pass-1 per-shard accumulator block
        return pl.BlockSpec((None,) + shape, lambda c, i: (c, 0, 0))

    # ---- Pass 1: global reductions only (no per-row HBM writes). -----------
    kvs_p, ksum_p, qsq_p, ksq_p = pl.pallas_call(
        functools.partial(_reduce_kernel, hc, tile, bps, N, need_mask, qkv_bias),
        out_shape=(
            jax.ShapeDtypeStruct((shards, hc, hc), f32),  # per-shard k^T v
            jax.ShapeDtypeStruct((shards, 1, hc), f32),   # per-shard sum_l k
            jax.ShapeDtypeStruct((shards, 1, hc), f32),   # per-shard sum q*q (per lane)
            jax.ShapeDtypeStruct((shards, 1, hc), f32),   # per-shard sum k*k (per lane)
        ),
        grid_spec=pltpu.PrefetchScalarGridSpec(
            num_scalar_prefetch=0,
            grid=(shards, bps),
            in_specs=[pl.BlockSpec((tile, C), x1_map),
                      full1((C, 3 * hc)),
                      full1((1, 3 * hc))],
            out_specs=(acc1((hc, hc)), acc1((1, hc)), acc1((1, hc)), acc1((1, hc))),
        ),
        compiler_params=pltpu.CompilerParams(
            dimension_semantics=("parallel", "arbitrary"),
            vmem_limit_bytes=vmem_limit),
    )(x_f, w_qvk, b_qvk)

    # ---- Tiny inter-pass glue: fold global normalizers into kvs / ksum. ----
    inv_qn = lax.rsqrt(jnp.sum(qsq_p))               # 1 / ||q||_F (global)
    inv_kn = lax.rsqrt(jnp.sum(ksq_p))               # 1 / ||k||_F (global)
    scale = inv_qn * inv_kn
    kvs_s = jnp.sum(kvs_p, axis=0) * scale           # (hc, hc)
    ksum_s = jnp.sum(ksum_p, axis=0) * scale         # (1, hc)

    # ---- Pass 2: per-row outputs (recompute q, v from x). -------------------
    out = pl.pallas_call(
        functools.partial(_output_kernel, hc, float(N), qkv_bias),
        out_shape=jax.ShapeDtypeStruct((N, hc), f32),
        grid_spec=pltpu.PrefetchScalarGridSpec(
            num_scalar_prefetch=0,
            grid=(nblk,),
            in_specs=[pl.BlockSpec((tile, C), lambda i: (i, 0)),
                      pl.BlockSpec((C, 2 * hc), lambda i: (0, 0)),
                      pl.BlockSpec((1, 2 * hc), lambda i: (0, 0)),
                      pl.BlockSpec((hc, hc), lambda i: (0, 0)),
                      pl.BlockSpec((1, hc), lambda i: (0, 0))],
            out_specs=pl.BlockSpec((tile, hc), lambda i: (i, 0)),
        ),
        compiler_params=pltpu.CompilerParams(
            dimension_semantics=("parallel",),
            vmem_limit_bytes=vmem_limit),
    )(x_f, w_qv, b_qv, kvs_s, ksum_s)

    return out


def sgformer_attention_ref(x, wq, wk, wv, bq, bk, bv):
    """Pure-JAX transcription of the PyTorch forward (heads = 1)."""
    qs = (x @ wq + bq)[:, None, :]
    ks = (x @ wk + bk)[:, None, :]
    vs = (x @ wv + bv)[:, None, :]
    qs = qs / jnp.linalg.norm(qs)            # global L2 (Frobenius) norm
    ks = ks / jnp.linalg.norm(ks)
    N = qs.shape[0]
    kvs = jnp.einsum('lhm,lhd->hmd', ks, vs)
    attention_num = jnp.einsum('nhm,hmd->nhd', qs, kvs) + N * vs
    ks_sum = jnp.einsum('lhm->hm', ks)
    normalizer = jnp.einsum('nhm,hm->nh', qs, ks_sum)[..., None] + N
    return (attention_num / normalizer).mean(axis=1)


if __name__ == "__main__":
    # Module config: channels=32, heads=1, head_channels=64
    channels, head_channels = 32, 64
    key = jax.random.PRNGKey(0)
    kx1, kx2, kq, kk, kv_, kb1, kb2, kb3 = jax.random.split(key, 8)

    scale = 1.0 / np.sqrt(channels)
    wq = jax.random.uniform(kq, (channels, head_channels), jnp.float32, -scale, scale)
    wk = jax.random.uniform(kk, (channels, head_channels), jnp.float32, -scale, scale)
    wv = jax.random.uniform(kv_, (channels, head_channels), jnp.float32, -scale, scale)

    # Case 1: qkv_bias=True, N <= tile (single full-extent block).
    N1 = 64
    x1 = jax.random.normal(kx1, (N1, channels), dtype=jnp.float32)
    bq = 0.1 * jax.random.normal(kb1, (1, head_channels), dtype=jnp.float32)
    bk = 0.1 * jax.random.normal(kb2, (1, head_channels), dtype=jnp.float32)
    bv = 0.1 * jax.random.normal(kb3, (1, head_channels), dtype=jnp.float32)
    out1 = jax.block_until_ready(
        sgformer_attention(x1, wq, wk, wv, bq, bk, bv,
                           head_channels=head_channels, qkv_bias=True))
    ref1 = sgformer_attention_ref(x1, wq, wk, wv, bq, bk, bv)
    np.testing.assert_allclose(np.asarray(out1), np.asarray(ref1), rtol=1e-4, atol=1e-4)

    # Case 2: qkv_bias=False, multi-block ragged tail with an odd block count
    # (exercises the 2-way sharded pass-1 reduction, the clamped index map,
    # the row mask, and Pallas's masked partial-block output writeback).
    N2 = 200
    x2 = jax.random.normal(kx2, (N2, channels), dtype=jnp.float32)
    z = jnp.zeros((1, head_channels), jnp.float32)
    out2 = jax.block_until_ready(
        sgformer_attention(x2, wq, wk, wv, z, z, z,
                           head_channels=head_channels, tile_n=48, qkv_bias=False))
    ref2 = sgformer_attention_ref(x2, wq, wk, wv, z, z, z)
    np.testing.assert_allclose(np.asarray(out2), np.asarray(ref2), rtol=1e-4, atol=1e-4)

    print("KERNEL_OK")
</pallas_src>

<mosaic_0001>
module attributes {stable_mosaic.version = 11 : i64} {
  func.func @_reduce_kernel(%arg0: i32, %arg1: i32, %arg2: memref<64x32xf32, #tpu.memory_space<vmem>>, %arg3: memref<32x192xf32, #tpu.memory_space<vmem>>, %arg4: memref<1x192xf32, #tpu.memory_space<vmem>>, %arg5: memref<1x64x64xf32, #tpu.memory_space<vmem>>, %arg6: memref<1x1x64xf32, #tpu.memory_space<vmem>>, %arg7: memref<1x1x64xf32, #tpu.memory_space<vmem>>, %arg8: memref<1x1x64xf32, #tpu.memory_space<vmem>>) attributes {dimension_semantics = [#tpu.dimension_semantics<parallel>, #tpu.dimension_semantics<arbitrary>], iteration_bounds = array<i64: 1, 1>, scalar_prefetch = 0 : i64, scratch_operands = 0 : i64, tpu.core_type = #tpu.core_type<tc>, window_params = [{transform_indices = @transform_0, window_bounds = array<i64: 64, 32>}, {pipeline_mode = #tpu.pipeline_mode<synchronous>, transform_indices = @transform_1, window_bounds = array<i64: 32, 192>}, {pipeline_mode = #tpu.pipeline_mode<synchronous>, transform_indices = @transform_2, window_bounds = array<i64: 1, 192>}, {transform_indices = @transform_3, window_bounds = array<i64: 1, 64, 64>}, {transform_indices = @transform_4, window_bounds = array<i64: 1, 1, 64>}, {transform_indices = @transform_5, window_bounds = array<i64: 1, 1, 64>}, {transform_indices = @transform_6, window_bounds = array<i64: 1, 1, 64>}]} {
    %c0 = arith.constant 0 : index
    %c0_0 = arith.constant 0 : index
    %0 = vector.load %arg2[%c0, %c0_0] : memref<64x32xf32, #tpu.memory_space<vmem>>, vector<64x32xf32>
    %c0_1 = arith.constant 0 : index
    %c0_2 = arith.constant 0 : index
    %1 = vector.load %arg3[%c0_1, %c0_2] : memref<32x192xf32, #tpu.memory_space<vmem>>, vector<32x192xf32>
    %cst = arith.constant dense<0.000000e+00> : vector<64x192xf32>
    %2 = tpu.matmul %0, %1, %cst {dimension_numbers = #tpu.dot_dimension_numbers<[1], [0], [0], [1], [0, 0, 1, 1], [], []>} : vector<64x32xf32>, vector<32x192xf32>, vector<64x192xf32> -> vector<64x192xf32>
    %c0_3 = arith.constant 0 : index
    %c0_4 = arith.constant 0 : index
    %3 = vector.load %arg4[%c0_3, %c0_4] : memref<1x192xf32, #tpu.memory_space<vmem>>, vector<1x192xf32>
    %4 = vector.broadcast %3 : vector<1x192xf32> to vector<64x192xf32>
    %5 = arith.addf %2, %4 : vector<64x192xf32>
    %6 = vector.extract_strided_slice %5 {offsets = [0, 0], sizes = [64, 64], strides = [1, 1]} : vector<64x192xf32> to vector<64x64xf32>
    %7 = vector.extract_strided_slice %5 {offsets = [0, 64], sizes = [64, 64], strides = [1, 1]} : vector<64x192xf32> to vector<64x64xf32>
    %8 = vector.extract_strided_slice %5 {offsets = [0, 128], sizes = [64, 64], strides = [1, 1]} : vector<64x192xf32> to vector<64x64xf32>
    %c0_i32 = arith.constant 0 : i32
    %9 = arith.cmpi eq, %arg1, %c0_i32 : i32
    %10 = arith.extui %9 : i1 to i32
    %c0_i32_5 = arith.constant 0 : i32
    %11 = arith.cmpi ne, %10, %c0_i32_5 : i32
    scf.if %11 {
      %cst_34 = arith.constant 0.000000e+00 : f32
      %45 = vector.broadcast %cst_34 : f32 to vector<64x64xf32>
      %c0_35 = arith.constant 0 : index
      %c0_36 = arith.constant 0 : index
      %c0_37 = arith.constant 0 : index
      %46 = vector.load %arg5[%c0_35, %c0_36, %c0_37] : memref<1x64x64xf32, #tpu.memory_space<vmem>>, vector<1x64x64xf32>
      %47 = vector.shape_cast %46 : vector<1x64x64xf32> to vector<64x64xf32>
      %48 = vector.shape_cast %45 : vector<64x64xf32> to vector<1x64x64xf32>
      tpu.vector_store %arg5[%c0_35, %c0_36, %c0_37], %48 {strides = array<i32>} : memref<1x64x64xf32, #tpu.memory_space<vmem>>, vector<1x64x64xf32>,
      %cst_38 = arith.constant 0.000000e+00 : f32
      %49 = vector.broadcast %cst_38 : f32 to vector<1x64xf32>
      %c0_39 = arith.constant 0 : index
      %c0_40 = arith.constant 0 : index
      %c0_41 = arith.constant 0 : index
      %50 = vector.load %arg6[%c0_39, %c0_40, %c0_41] : memref<1x1x64xf32, #tpu.memory_space<vmem>>, vector<1x1x64xf32>
      %51 = vector.shape_cast %50 : vector<1x1x64xf32> to vector<1x64xf32>
      %52 = vector.shape_cast %49 : vector<1x64xf32> to vector<1x1x64xf32>
      tpu.vector_store %arg6[%c0_39, %c0_40, %c0_41], %52 {strides = array<i32>} : memref<1x1x64xf32, #tpu.memory_space<vmem>>, vector<1x1x64xf32>,
      %cst_42 = arith.constant 0.000000e+00 : f32
      %53 = vector.broadcast %cst_42 : f32 to vector<1x64xf32>
      %c0_43 = arith.constant 0 : index
      %c0_44 = arith.constant 0 : index
      %c0_45 = arith.constant 0 : index
      %54 = vector.load %arg7[%c0_43, %c0_44, %c0_45] : memref<1x1x64xf32, #tpu.memory_space<vmem>>, vector<1x1x64xf32>
      %55 = vector.shape_cast %54 : vector<1x1x64xf32> to vector<1x64xf32>
      %56 = vector.shape_cast %53 : vector<1x64xf32> to vector<1x1x64xf32>
      tpu.vector_store %arg7[%c0_43, %c0_44, %c0_45], %56 {strides = array<i32>} : memref<1x1x64xf32, #tpu.memory_space<vmem>>, vector<1x1x64xf32>,
      %cst_46 = arith.constant 0.000000e+00 : f32
      %57 = vector.broadcast %cst_46 : f32 to vector<1x64xf32>
      %c0_47 = arith.constant 0 : index
      %c0_48 = arith.constant 0 : index
      %c0_49 = arith.constant 0 : index
      %58 = vector.load %arg8[%c0_47, %c0_48, %c0_49] : memref<1x1x64xf32, #tpu.memory_space<vmem>>, vector<1x1x64xf32>
      %59 = vector.shape_cast %58 : vector<1x1x64xf32> to vector<1x64xf32>
      %60 = vector.shape_cast %57 : vector<1x64xf32> to vector<1x1x64xf32>
      tpu.vector_store %arg8[%c0_47, %c0_48, %c0_49], %60 {strides = array<i32>} : memref<1x1x64xf32, #tpu.memory_space<vmem>>, vector<1x1x64xf32>,
    } else {
    }
    %c0_6 = arith.constant 0 : index
    %c0_7 = arith.constant 0 : index
    %c0_8 = arith.constant 0 : index
    %12 = vector.load %arg5[%c0_6, %c0_7, %c0_8] : memref<1x64x64xf32, #tpu.memory_space<vmem>>, vector<1x64x64xf32>
    %13 = vector.shape_cast %12 : vector<1x64x64xf32> to vector<64x64xf32>
    %cst_9 = arith.constant dense<0.000000e+00> : vector<64x64xf32>
    %14 = tpu.matmul %8, %7, %cst_9 {dimension_numbers = #tpu.dot_dimension_numbers<[0], [0], [1], [1], [0, 1, 1, 1], [], []>} : vector<64x64xf32>, vector<64x64xf32>, vector<64x64xf32> -> vector<64x64xf32>
    %15 = arith.addf %13, %14 : vector<64x64xf32>
    %c0_10 = arith.constant 0 : index
    %c0_11 = arith.constant 0 : index
    %c0_12 = arith.constant 0 : index
    %16 = vector.load %arg5[%c0_10, %c0_11, %c0_12] : memref<1x64x64xf32, #tpu.memory_space<vmem>>, vector<1x64x64xf32>
    %17 = vector.shape_cast %16 : vector<1x64x64xf32> to vector<64x64xf32>
    %18 = vector.shape_cast %15 : vector<64x64xf32> to vector<1x64x64xf32>
    tpu.vector_store %arg5[%c0_10, %c0_11, %c0_12], %18 {strides = array<i32>} : memref<1x64x64xf32, #tpu.memory_space<vmem>>, vector<1x64x64xf32>,
    %c0_13 = arith.constant 0 : index
    %c0_14 = arith.constant 0 : index
    %c0_15 = arith.constant 0 : index
    %19 = vector.load %arg6[%c0_13, %c0_14, %c0_15] : memref<1x1x64xf32, #tpu.memory_space<vmem>>, vector<1x1x64xf32>
    %20 = vector.shape_cast %19 : vector<1x1x64xf32> to vector<1x64xf32>
    %cst_16 = arith.constant dense<0.000000e+00> : vector<64xf32>
    %21 = vector.multi_reduction <add>, %8, %cst_16 [0] : vector<64x64xf32> to vector<64xf32>
    %22 = vector.shape_cast %21 : vector<64xf32> to vector<1x64xf32>
    %23 = arith.addf %20, %22 : vector<1x64xf32>
    %c0_17 = arith.constant 0 : index
    %c0_18 = arith.constant 0 : index
    %c0_19 = arith.constant 0 : index
    %24 = vector.load %arg6[%c0_17, %c0_18, %c0_19] : memref<1x1x64xf32, #tpu.memory_space<vmem>>, vector<1x1x64xf32>
    %25 = vector.shape_cast %24 : vector<1x1x64xf32> to vector<1x64xf32>
    %26 = vector.shape_cast %23 : vector<1x64xf32> to vector<1x1x64xf32>
    tpu.vector_store %arg6[%c0_17, %c0_18, %c0_19], %26 {strides = array<i32>} : memref<1x1x64xf32, #tpu.memory_space<vmem>>, vector<1x1x64xf32>,
    %c0_20 = arith.constant 0 : index
    %c0_21 = arith.constant 0 : index
    %c0_22 = arith.constant 0 : index
    %27 = vector.load %arg7[%c0_20, %c0_21, %c0_22] : memref<1x1x64xf32, #tpu.memory_space<vmem>>, vector<1x1x64xf32>
    %28 = vector.shape_cast %27 : vector<1x1x64xf32> to vector<1x64xf32>
    %29 = arith.mulf %6, %6 : vector<64x64xf32>
    %cst_23 = arith.constant dense<0.000000e+00> : vector<64xf32>
    %30 = vector.multi_reduction <add>, %29, %cst_23 [0] : vector<64x64xf32> to vector<64xf32>
    %31 = vector.shape_cast %30 : vector<64xf32> to vector<1x64xf32>
    %32 = arith.addf %28, %31 : vector<1x64xf32>
    %c0_24 = arith.constant 0 : index
    %c0_25 = arith.constant 0 : index
    %c0_26 = arith.constant 0 : index
    %33 = vector.load %arg7[%c0_24, %c0_25, %c0_26] : memref<1x1x64xf32, #tpu.memory_space<vmem>>, vector<1x1x64xf32>
    %34 = vector.shape_cast %33 : vector<1x1x64xf32> to vector<1x64xf32>
    %35 = vector.shape_cast %32 : vector<1x64xf32> to vector<1x1x64xf32>
    tpu.vector_store %arg7[%c0_24, %c0_25, %c0_26], %35 {strides = array<i32>} : memref<1x1x64xf32, #tpu.memory_space<vmem>>, vector<1x1x64xf32>,
    %c0_27 = arith.constant 0 : index
    %c0_28 = arith.constant 0 : index
    %c0_29 = arith.constant 0 : index
    %36 = vector.load %arg8[%c0_27, %c0_28, %c0_29] : memref<1x1x64xf32, #tpu.memory_space<vmem>>, vector<1x1x64xf32>
    %37 = vector.shape_cast %36 : vector<1x1x64xf32> to vector<1x64xf32>
    %38 = arith.mulf %8, %8 : vector<64x64xf32>
    %cst_30 = arith.constant dense<0.000000e+00> : vector<64xf32>
    %39 = vector.multi_reduction <add>, %38, %cst_30 [0] : vector<64x64xf32> to vector<64xf32>
    %40 = vector.shape_cast %39 : vector<64xf32> to vector<1x64xf32>
    %41 = arith.addf %37, %40 : vector<1x64xf32>
    %c0_31 = arith.constant 0 : index
    %c0_32 = arith.constant 0 : index
    %c0_33 = arith.constant 0 : index
    %42 = vector.load %arg8[%c0_31, %c0_32, %c0_33] : memref<1x1x64xf32, #tpu.memory_space<vmem>>, vector<1x1x64xf32>
    %43 = vector.shape_cast %42 : vector<1x1x64xf32> to vector<1x64xf32>
    %44 = vector.shape_cast %41 : vector<1x64xf32> to vector<1x1x64xf32>
    tpu.vector_store %arg8[%c0_31, %c0_32, %c0_33], %44 {strides = array<i32>} : memref<1x1x64xf32, #tpu.memory_space<vmem>>, vector<1x1x64xf32>,
    return
  }
  func.func @transform_0(%arg0: i32, %arg1: i32) -> (i32, i32) {
    %c1_i32 = arith.constant 1 : i32
    %0 = arith.muli %arg0, %c1_i32 : i32
    %1 = arith.addi %0, %arg1 : i32
    %c0_i32 = arith.constant 0 : i32
    %c0_i32_0 = arith.constant 0 : i32
    return %1, %c0_i32 : i32, i32
  }
  func.func @transform_1(%arg0: i32, %arg1: i32) -> (i32, i32) {
    %c0_i32 = arith.constant 0 : i32
    %c0_i32_0 = arith.constant 0 : i32
    %c0_i32_1 = arith.constant 0 : i32
    return %c0_i32, %c0_i32_0 : i32, i32
  }
  func.func @transform_2(%arg0: i32, %arg1: i32) -> (i32, i32) {
    %c0_i32 = arith.constant 0 : i32
    %c0_i32_0 = arith.constant 0 : i32
    %c0_i32_1 = arith.constant 0 : i32
    return %c0_i32, %c0_i32_0 : i32, i32
  }
  func.func @transform_3(%arg0: i32, %arg1: i32) -> (i32, i32, i32) {
    %c0_i32 = arith.constant 0 : i32
    %c0_i32_0 = arith.constant 0 : i32
    %c0_i32_1 = arith.constant 0 : i32
    return %arg0, %c0_i32, %c0_i32_0 : i32, i32, i32
  }
  func.func @transform_4(%arg0: i32, %arg1: i32) -> (i32, i32, i32) {
    %c0_i32 = arith.constant 0 : i32
    %c0_i32_0 = arith.constant 0 : i32
    %c0_i32_1 = arith.constant 0 : i32
    return %arg0, %c0_i32, %c0_i32_0 : i32, i32, i32
  }
  func.func @transform_5(%arg0: i32, %arg1: i32) -> (i32, i32, i32) {
    %c0_i32 = arith.constant 0 : i32
    %c0_i32_0 = arith.constant 0 : i32
    %c0_i32_1 = arith.constant 0 : i32
    return %arg0, %c0_i32, %c0_i32_0 : i32, i32, i32
  }
  func.func @transform_6(%arg0: i32, %arg1: i32) -> (i32, i32, i32) {
    %c0_i32 = arith.constant 0 : i32
    %c0_i32_0 = arith.constant 0 : i32
    %c0_i32_1 = arith.constant 0 : i32
    return %arg0, %c0_i32, %c0_i32_0 : i32, i32, i32
  }
}

</mosaic_0001>

<bundles_post_ra>
// kernel: tpu_custom_call.1
= control target key start
LH: loop header
LB: loop body
LE: loop exit
PB: predicated region body
PF: predicated region fallthrough
CT: control target
= control target key end

     0   :  { %12 = vsyncpa [#allocation3], 0  ;;  %s875_s0 = inlined_call_operand.vmem [shape: f32[64,32], index: 0, kind: input, shape index: {}]   ;;  %s876_s1 = inlined_call_operand.vmem [shape: f32[32,192], index: 1, kind: input, shape index: {}]   ;;  %s877_s2 = inlined_call_operand.vmem [shape: f32[1,192], index: 2, kind: input, shape index: {}]   ;;  %s878_s3 = inlined_call_operand.hbm [shape: f32[1,64,64], index: 3, kind: output, shape index: {0}]   ;;  %s879_s4 = inlined_call_operand.hbm [shape: f32[1,1,64], index: 4, kind: output, shape index: {1}]   ;;  %s880_s5 = inlined_call_operand.hbm [shape: f32[1,1,64], index: 5, kind: output, shape index: {2}]   ;;  %s881_s6 = inlined_call_operand.hbm [shape: f32[1,1,64], index: 6, kind: output, shape index: {3}]  }
   0x1   :  { %13 = vsyncpa [#allocation5], 0  ;;  %v57_v0 = vld [vmem:[%s876_s1 + $0x30] sm:$0xff]  ;;  %v58_v1 = vld [vmem:[%s876_s1 + $0x38] sm:$0xff] }
   0x2   :  { %v55_v2 = vld [vmem:[%s876_s1 + $0x20] sm:$0xff]  ;;  %102 = vmatpush.msra.mxu0 %v57_v0  ;;  %143 = vmatpush.msra.mxu1 %v58_v1  ;;  %v56_v3 = vld [vmem:[%s876_s1 + $0x28] sm:$0xff]  ;;  %v53_v4 = vld [vmem:[%s876_s1 + $0x10] sm:$0xff] }
   0x3   :  { %v54_v5 = vld [vmem:[%s876_s1 + $0x18] sm:$0xff]  ;;  %v51_v6 = vld [vmem:[%s876_s1] sm:$0xff]  ;;  %v52_v7 = vld [vmem:[%s876_s1 + $0x8] sm:$0xff] }
   0x4   :  { %103 = vmatpush.msra.mxu0 %v55_v2  ;;  %144 = vmatpush.msra.mxu1 %v56_v3 }
   0x5   :  { %14 = vsyncpa [#allocation8], 0  ;;  %v43_v8 = vld [vmem:[%s875_s0] sm:$0xff]  ;;  %vm65_vm0 = vcmask 261120   ;;  %v44_v9 = vld [vmem:[%s875_s0 + $0x8] sm:$0xff]  ;;  %vm176_vm1 = vcmask 523264  }
   0x6   :  { %104 = vmatpush.msra.mxu0 %v53_v4  ;;  %145 = vmatpush.msra.mxu1 %v54_v5  ;;  %v45_v10 = vld [vmem:[%s875_s0 + $0x10] sm:$0xff]  ;;  %v46_v11 = vld [vmem:[%s875_s0 + $0x18] sm:$0xff]  ;;  %v47_v12 = vld [vmem:[%s875_s0 + $0x20] sm:$0xff]  ;;  %v666_v39 = vmov 0.0   ;;  %vm185_vm2 = vcmask 516096   ;;  %s452_s9 = sshll.u32 %s879_s4, 4  ;;  %s453_s9 = int_to_ptr.hbm [resolvable:$true] %s452_s9 }
   0x7   :  { %v48_v13 = vld [vmem:[%s875_s0 + $0x28] sm:$0xff]  ;;  %v49_v14 = vld [vmem:[%s875_s0 + $0x30] sm:$0xff]  ;;  %v50_v15 = vld [vmem:[%s875_s0 + $0x38] sm:$0xff]  ;;  %s665_s0 = smov 64   ;;  %177 = vst.msk [vmem:[#allocation2] sm:$0xff] %vm176_vm1, %v666_v39  ;;  %s668_s10 = smov [#allocation6]  }
   0x8   :  { %105 = vmatpush.msra.mxu0 %v51_v6  ;;  %146 = vmatpush.msra.mxu1 %v52_v7  ;;  %v59_v16 = vld [vmem:[%s877_s2] sm:$0x3]  ;;  %178 = vst.msk [vmem:[#allocation2 + $0x8] sm:$0xff] %vm176_vm1, %v666_v39  ;;  %s667_s2 = smov [#allocation4]   ;;  %s461_s11 = sshll.u32 %s668_s10, 4  ;;  %s462_s11 = int_to_ptr.vmem [resolvable:$true] %s461_s11 }
   0x9   :  { %503 = vmatmul.msk.f32.vlgmr.msra.gmra.mxu0 %vm65_vm0, %v43_v8  ;;  %511 = vmatmul.msk.f32.vlgmr.msra.gmra.mxu1 %vm65_vm0, %v43_v8  ;;  %v775_v17 = vperm.slane %v59_v16, 1  ;;  %v780_v27 = vperm.slane %v59_v16, 0  ;;  %179 = vst.msk [vmem:[#allocation2 + $0x10] sm:$0xff] %vm176_vm1, %v666_v39  ;;  %s450_s30 = sshll.u32 %s667_s2, 4  ;;  %s463_s14 = sshll.u32 %s880_s5, 4  ;;  %s451_s30 = int_to_ptr.vmem [resolvable:$true] %s450_s30  ;;  %s464_s14 = int_to_ptr.hbm [resolvable:$true] %s463_s14 }
   0xa   :  { %180 = vst.msk [vmem:[#allocation2 + $0x18] sm:$0xff] %vm176_vm1, %v666_v39  ;;  %s474_s1 = sshll.u32 %s881_s6, 4  ;;  %s669_s17 = smov [#allocation7]   ;;  %s475_s1 = int_to_ptr.hbm [resolvable:$true] %s474_s1 }
   0xb   :  { %181 = vst.msk [vmem:[#allocation2 + $0x20] sm:$0xff] %vm176_vm1, %v666_v39  ;;  %s472_s18 = sshll.u32 %s669_s17, 4  ;;  %s670_s4 = smov [#allocation2]   ;;  %s473_s18 = int_to_ptr.vmem [resolvable:$true] %s472_s18 }
   0xc   :  { %182 = vst.msk [vmem:[#allocation2 + $0x28] sm:$0xff] %vm176_vm1, %v666_v39  ;;  %s436_s5 = sshll.u32 %s670_s4, 4  ;;  %s438_s20 = sshll.u32 %s878_s3, 4  ;;  %s437_s5 = int_to_ptr.vmem [resolvable:$true] %s436_s5  ;;  %s439_s20 = int_to_ptr.hbm [resolvable:$true] %s438_s20 }
   0xd   :  { %183 = vst.msk [vmem:[#allocation2 + $0x30] sm:$0xff] %vm176_vm1, %v666_v39  ;;  %s671_s21 = smov 128   ;;  %s672_s22 = smov 8  }
   0xe   :  { %184 = vst.msk [vmem:[#allocation2 + $0x38] sm:$0xff] %vm176_vm1, %v666_v39 }
   0xf   :  { %186 = vst.msk [vmem:[#allocation4] sm:$0x1] %vm185_vm2, %v666_v39 }
  0x10   :  { %187 = vst.msk [vmem:[#allocation6] sm:$0x1] %vm185_vm2, %v666_v39 }
  0x11   :  { %504 = vmatmul.msk.f32.gmra.mxu0 %vm65_vm0, %v44_v9  ;;  %512 = vmatmul.msk.f32.gmra.mxu1 %vm65_vm0, %v44_v9  ;;  %188 = vst.msk [vmem:[#allocation7] sm:$0x1] %vm185_vm2, %v666_v39 }
  0x19   :  { %505 = vmatmul.msk.f32.gmra.mxu0 %vm65_vm0, %v45_v10  ;;  %513 = vmatmul.msk.f32.gmra.mxu1 %vm65_vm0, %v45_v10 }
  0x21   :  { %506 = vmatmul.msk.f32.gmra.mxu0 %vm65_vm0, %v46_v11  ;;  %514 = vmatmul.msk.f32.gmra.mxu1 %vm65_vm0, %v46_v11 }
  0x29   :  { %507 = vmatmul.msk.f32.gmra.mxu0 %vm65_vm0, %v47_v12  ;;  %515 = vmatmul.msk.f32.gmra.mxu1 %vm65_vm0, %v47_v12 }
  0x31   :  { %508 = vmatmul.msk.f32.gmra.mxu0 %vm65_vm0, %v48_v13  ;;  %516 = vmatmul.msk.f32.gmra.mxu1 %vm65_vm0, %v48_v13 }
  0x39   :  { %509 = vmatmul.msk.f32.gmra.mxu0 %vm65_vm0, %v49_v14  ;;  %517 = vmatmul.msk.f32.gmra.mxu1 %vm65_vm0, %v49_v14 }
  0x41   :  { %510 = vmatmul.msk.f32.gmra.mxu0 %vm65_vm0, %v50_v15  ;;  %518 = vmatmul.msk.f32.gmra.mxu1 %vm65_vm0, %v50_v15 }
  0x86   :  { %v107_v18 = vpop.f32.mrf.mxu0  ;;  %v148_v19 = vpop.f32.mrf.mxu1 }
  0x87   :  { %v149_v20 = vadd.f32 %v148_v19, %v775_v17  ;;  %v108_v37 = vadd.f32 %v107_v18, %v780_v27 }
  0x89   :  { %197 = vxpose.xlu2.b32.start [1/8] (short) (narrow) %v149_v20, 64  ;;  %v401_v41 = vmul.f32 %v149_v20, %v149_v20  ;;  %v344_v45 = vsel %vm176_vm1, %v149_v20, 0.0  ;;  %v369_v52 = vmul.f32 %v108_v37, %v108_v37 }
  0x8b   :  { %v409_v48 = vsel %vm176_vm1, %v401_v41, 0.0  ;;  %v377_v63 = vsel %vm176_vm1, %v369_v52, 0.0 }
  0x8e   :  { %v110_v21 = vpop.f32.mrf.mxu0  ;;  %v151_v22 = vpop.f32.mrf.mxu1 }
  0x8f   :  { %v152_v23 = vadd.f32 %v151_v22, %v775_v17  ;;  %v111_v34 = vadd.f32 %v110_v21, %v780_v27 }
  0x91   :  { %198 = vxpose.xlu2.b32.cont [2/8] (short) (narrow) %v152_v23, 64  ;;  %v558_v40 = vpack.i.bf16 %v108_v37, %v111_v34  ;;  %v402_v42 = vmul.f32 %v152_v23, %v152_v23  ;;  %v345_v46 = vsel %vm176_vm1, %v152_v23, 0.0  ;;  %v370_v49 = vmul.f32 %v111_v34, %v111_v34 }
  0x92   :  { %v346_v53 = vadd.f32 %v345_v46, %v344_v45 }
  0x93   :  { %v410_v50 = vsel %vm176_vm1, %v402_v42, 0.0  ;;  %v378_v59 = vsel %vm176_vm1, %v370_v49, 0.0 }
  0x94   :  { %v411_v57 = vadd.f32 %v410_v50, %v409_v48  ;;  %v379_v9 = vadd.f32 %v378_v59, %v377_v63 }
  0x96   :  { %v113_v24 = vpop.f32.mrf.mxu0  ;;  %v154_v25 = vpop.f32.mrf.mxu1 }
  0x97   :  { %v155_v26 = vadd.f32 %v154_v25, %v775_v17  ;;  %v114_v30 = vadd.f32 %v113_v24, %v780_v27 }
  0x99   :  { %199 = vxpose.xlu2.b32.cont [3/8] (short) (narrow) %v155_v26, 64  ;;  %v403_v51 = vmul.f32 %v155_v26, %v155_v26  ;;  %v371_v54 = vmul.f32 %v114_v30, %v114_v30  ;;  %v347_v56 = vsel %vm176_vm1, %v155_v26, 0.0 }
  0x9a   :  { %v348_v1 = vadd.f32 %v347_v56, %v346_v53 }
  0x9b   :  { %v412_v60 = vsel %vm176_vm1, %v403_v51, 0.0  ;;  %v380_v0 = vsel %vm176_vm1, %v371_v54, 0.0 }
  0x9c   :  { %v413_v10 = vadd.f32 %v412_v60, %v411_v57  ;;  %v381_v16 = vadd.f32 %v380_v0, %v379_v9  ;;  %v400_v9 = vld [vmem:[#allocation7] sm:$0x1] }
  0x9e   :  { %v116_v28 = vpop.f32.mrf.mxu0  ;;  %v157_v29 = vpop.f32.mrf.mxu1 }
  0x9f   :  { %v117_v31 = vadd.f32 %v116_v28, %v780_v27  ;;  %v158_v32 = vadd.f32 %v157_v29, %v775_v17 }
  0xa1   :  { %v553_v33 = vpack.i.bf16 %v114_v30, %v117_v31  ;;  %200 = vxpose.xlu2.b32.cont [4/8] (short) (narrow) %v158_v32, 64  ;;  %v372_v58 = vmul.f32 %v117_v31, %v117_v31  ;;  %v404_v61 = vmul.f32 %v158_v32, %v158_v32  ;;  %v349_v5 = vsel %vm176_vm1, %v158_v32, 0.0 }
  0xa2   :  { %v350_v18 = vadd.f32 %v349_v5, %v348_v1 }
  0xa3   :  { %554 = vrot.lane.b32.xlu1 %v553_v33, %s665_s0  ;;  %v382_v11 = vsel %vm176_vm1, %v372_v58, 0.0  ;;  %v414_v12 = vsel %vm176_vm1, %v404_v61, 0.0 }
  0xa4   :  { %v383_v24 = vadd.f32 %v382_v11, %v381_v16  ;;  %v415_v25 = vadd.f32 %v414_v12, %v413_v10 }
  0xa6   :  { %v119_v35 = vpop.f32.mrf.mxu0  ;;  %v160_v36 = vpop.f32.mrf.mxu1 }
  0xa7   :  { %v161_v38 = vadd.f32 %v160_v36, %v775_v17  ;;  %v806_v55 = vadd.f32 %v119_v35, %v780_v27 }
  0xa9   :  { %201 = vxpose.xlu2.b32.cont [5/8] (short) (narrow) %v161_v38, 64  ;;  %v373_v2 = vmul.f32 %v806_v55, %v806_v55  ;;  %v405_v6 = vmul.f32 %v161_v38, %v161_v38  ;;  %v351_v13 = vsel %vm176_vm1, %v161_v38, 0.0 }
  0xaa   :  { %v352_v26 = vadd.f32 %v351_v13, %v350_v18 }
  0xab   :  { %559 = vrot.lane.b32.xlu1 %v558_v40, %s665_s0  ;;  %v384_v19 = vsel %vm176_vm1, %v373_v2, 0.0  ;;  %v416_v20 = vsel %vm176_vm1, %v405_v6, 0.0 }
  0xac   :  { %v385_v31 = vadd.f32 %v384_v19, %v383_v24  ;;  %v417_v32 = vadd.f32 %v416_v20, %v415_v25 }
  0xae   :  { %v122_v43 = vpop.f32.mrf.mxu0  ;;  %v163_v44 = vpop.f32.mrf.mxu1 }
  0xaf   :  { %v164_v47 = vadd.f32 %v163_v44, %v775_v17  ;;  %v813_v62 = vadd.f32 %v122_v43, %v780_v27 }
  0xb1   :  { %202 = vxpose.xlu2.b32.cont [6/8] (short) (narrow) %v164_v47, 64  ;;  %v374_v14 = vmul.f32 %v813_v62, %v813_v62  ;;  %v406_v15 = vmul.f32 %v164_v47, %v164_v47  ;;  %v353_v21 = vsel %vm176_vm1, %v164_v47, 0.0  ;;  %v548_v60 = vpack.i.bf16 %v806_v55, %v813_v62 }
  0xb2   :  { %v354_v33 = vadd.f32 %v353_v21, %v352_v26 }
  0xb3   :  { %v386_v28 = vsel %vm176_vm1, %v374_v14, 0.0  ;;  %v418_v29 = vsel %vm176_vm1, %v406_v15, 0.0 }
  0xb4   :  { %v387_v40 = vadd.f32 %v386_v28, %v385_v31  ;;  %v419_v41 = vadd.f32 %v418_v29, %v417_v32 }
  0xb6   :  { %v125_v3 = vpop.f32.mrf.mxu0  ;;  %v166_v4 = vpop.f32.mrf.mxu1 }
  0xb7   :  { %v126_v7 = vadd.f32 %v125_v3, %v780_v27  ;;  %v167_v8 = vadd.f32 %v166_v4, %v775_v17  ;;  %v343_v4 = vld [vmem:[#allocation4] sm:$0x1] }
  0xb9   :  { %203 = vxpose.xlu2.b32.cont [7/8] (short) (narrow) %v167_v8, 64  ;;  %v375_v22 = vmul.f32 %v126_v7, %v126_v7  ;;  %v407_v23 = vmul.f32 %v167_v8, %v167_v8  ;;  %v355_v30 = vsel %vm176_vm1, %v167_v8, 0.0  ;;  %v368_v8 = vld [vmem:[#allocation6] sm:$0x1] }
  0xba   :  { %v356_v42 = vadd.f32 %v355_v30, %v354_v33 }
  0xbb   :  { %v388_v36 = vsel %vm176_vm1, %v375_v22, 0.0  ;;  %v420_v37 = vsel %vm176_vm1, %v407_v23, 0.0 }
  0xbc   :  { %v389_v47 = vadd.f32 %v388_v36, %v387_v40  ;;  %v421_v48 = vadd.f32 %v420_v37, %v419_v41 }
  0xbe   :  { %v128_v34 = vpop.f32.mrf.mxu0  ;;  %v169_v35 = vpop.f32.mrf.mxu1 }
  0xbf   :  { %v129_v38 = vadd.f32 %v128_v34, %v780_v27  ;;  %v170_v39 = vadd.f32 %v169_v35, %v775_v17  ;;  %v189_v35 = vld [vmem:[#allocation2] sm:$0xff] }
  0xc1   :  { %v376_v43 = vmul.f32 %v129_v38, %v129_v38  ;;  %v357_v44 = vsel %vm176_vm1, %v170_v39, 0.0  ;;  %v408_v45 = vmul.f32 %v170_v39, %v170_v39  ;;  %v543_v46 = vpack.i.bf16 %v126_v7, %v129_v38  ;;  %204 = vxpose.xlu2.b32.end [8/8] (short) (narrow) %v170_v39, 64  ;;  %v190_v38 = vld [vmem:[#allocation2 + $0x8] sm:$0xff]  ;;  %v195_v39 = vld [vmem:[#allocation2 + $0x30] sm:$0xff] }
  0xc2   :  { %v358_v49 = vadd.f32 %v357_v44, %v356_v42  ;;  %v191_v44 = vld [vmem:[#allocation2 + $0x10] sm:$0xff] }
  0xc3   :  { %v390_v50 = vsel %vm176_vm1, %v376_v43, 0.0  ;;  %v422_v51 = vsel %vm176_vm1, %v408_v45, 0.0  ;;  %544 = vrot.lane.b32.xlu0 %v543_v46, %s665_s0  ;;  %v196_v45 = vld [vmem:[#allocation2 + $0x38] sm:$0xff] }
  0xc4   :  { %v391_v27 = vadd.f32 %v390_v50, %v389_v47  ;;  %v359_v17 = vrot.slane %v358_v49, 4  ;;  %v423_v52 = vadd.f32 %v422_v51, %v421_v48  ;;  %v192_v50 = vld [vmem:[#allocation2 + $0x18] sm:$0xff] }
  0xc6   :  { %v392_v53 = vrot.slane %v391_v27, 4  ;;  %v360_v54 = vadd.f32 %v359_v17, %v358_v49  ;;  %v424_v56 = vrot.slane %v423_v52, 4  ;;  %v193_v17 = vld [vmem:[#allocation2 + $0x20] sm:$0xff] }
  0xc8   :  { %v393_v57 = vadd.f32 %v392_v53, %v391_v27  ;;  %v361_v58 = vrot.slane %v360_v54, 2  ;;  %v425_v59 = vadd.f32 %v424_v56, %v423_v52 }
  0xca   :  { %v394_v61 = vrot.slane %v393_v57, 2  ;;  %v362_v63 = vadd.f32 %v361_v58, %v360_v54  ;;  %v426_v0 = vrot.slane %v425_v59, 2  ;;  %v194_v54 = vld [vmem:[#allocation2 + $0x28] sm:$0xff] }
  0xcb   :  { %549 = vrot.lane.b32.xlu0 %v548_v60, %s665_s0 }
  0xcc   :  { %v395_v1 = vadd.f32 %v394_v61, %v393_v57  ;;  %v427_v2 = vadd.f32 %v426_v0, %v425_v59  ;;  %v363_v3 = vrot.slane %v362_v63, 1 }
  0xce   :  { %v396_v5 = vrot.slane %v395_v1, 1  ;;  %v364_v6 = vadd.f32 %v363_v3, %v362_v63  ;;  %v428_v7 = vrot.slane %v427_v2, 1 }
  0xd0   :  { %v365_v10 = vadd.f32 %v364_v6, %v343_v4  ;;  %v397_v11 = vadd.f32 %v396_v5, %v395_v1  ;;  %v429_v12 = vadd.f32 %v428_v7, %v427_v2 }
  0xd2   :  { %367 = vst.msk [vmem:[#allocation4] sm:$0x1] %vm185_vm2, %v365_v10  ;;  %v398_v55 = vadd.f32 %v397_v11, %v368_v8  ;;  %v430_v62 = vadd.f32 %v429_v12, %v400_v9 }
  0xd3   :  { %455 = dma.vmem_to_hbm [thread:$0]  %s451_s30, 16, %s453_s9, [#allocation5]  }
  0xd4   :  { %399 = vst.msk [vmem:[#allocation6] sm:$0x1] %vm185_vm2, %v398_v55 }
  0xd5   :  { %431 = vst.msk [vmem:[#allocation7] sm:$0x1] %vm185_vm2, %v430_v62  ;;  %466 = dma.vmem_to_hbm [thread:$0]  %s462_s11, 16, %s464_s14, [#allocation5]  }
  0xd6   :  { %477 = dma.vmem_to_hbm [thread:$0]  %s473_s18, 16, %s475_s1, [#allocation8]  }
 0x115   :  { %v555_v20 = vpop.permute.xlu1 %554 }
 0x116   :  { %v556_v25 = vunpack.i.l.bf16 %v555_v20  ;;  %v557_v29 = vunpack.i.h.bf16 %v555_v20 }
 0x11d   :  { %v560_v28 = vpop.permute.xlu1 %559 }
 0x11e   :  { %v561_v30 = vunpack.i.l.bf16 %v560_v28  ;;  %v562_v31 = vunpack.i.h.bf16 %v560_v28 }
 0x122   :  { %v213_v13 = vpop.trf.xlu2 }
 0x12a   :  { %v214_v14 = vpop.trf.xlu2 }
 0x132   :  { %v215_v15 = vpop.trf.xlu2 }
 0x135   :  { %v545_v16 = vpop.permute.xlu0 %544 }
 0x136   :  { %v546_v18 = vunpack.i.l.bf16 %v545_v16  ;;  %v547_v19 = vunpack.i.h.bf16 %v545_v16 }
 0x138   :  { %294 = vmatpush.msra.mxu2 %v546_v18  ;;  %527 = vmatpush.msra.mxu3 %v546_v18 }
 0x13a   :  { %295 = vmatpush.msra.mxu2 %v547_v19  ;;  %528 = vmatpush.msra.mxu3 %v547_v19  ;;  %v216_v21 = vpop.trf.xlu2 }
 0x13d   :  { %v550_v22 = vpop.permute.xlu0 %549 }
 0x13e   :  { %v551_v23 = vunpack.i.l.bf16 %v550_v22  ;;  %v552_v24 = vunpack.i.h.bf16 %v550_v22 }
 0x140   :  { %296 = vmatpush.msra.mxu2 %v551_v23  ;;  %529 = vmatpush.msra.mxu3 %v551_v23 }
 0x142   :  { %297 = vmatpush.msra.mxu2 %v552_v24  ;;  %530 = vmatpush.msra.mxu3 %v552_v24  ;;  %v217_v26 = vpop.trf.xlu2 }
 0x144   :  { %298 = vmatpush.msra.mxu2 %v556_v25  ;;  %531 = vmatpush.msra.mxu3 %v556_v25 }
 0x146   :  { %299 = vmatpush.msra.mxu2 %v557_v29  ;;  %532 = vmatpush.msra.mxu3 %v557_v29 }
 0x148   :  { %300 = vmatpush.msra.mxu2 %v561_v30  ;;  %533 = vmatpush.msra.mxu3 %v561_v30 }
 0x14a   :  { %301 = vmatpush.msra.mxu2 %v562_v31  ;;  %534 = vmatpush.msra.mxu3 %v562_v31  ;;  %v218_v32 = vpop.trf.xlu2 }
 0x14b   :  { %519 = vmatmul.msk.f32.vlgmr.msra.gmra.mxu2 %vm176_vm1, %v213_v13 }
 0x152   :  { %v219_v33 = vpop.trf.xlu2 }
 0x153   :  { %520 = vmatmul.msk.f32.gmra.mxu2 %vm176_vm1, %v214_v14  ;;  %525 = vmatmul.msk.f32.vlgmr.msra.gmra.mxu3 %vm176_vm1, %v219_v33 }
 0x15a   :  { %v220_v34 = vpop.trf.xlu2 }
 0x15b   :  { %521 = vmatmul.msk.f32.gmra.mxu2 %vm176_vm1, %v215_v15  ;;  %526 = vmatmul.msk.f32.gmra.mxu3 %vm176_vm1, %v220_v34 }
 0x163   :  { %522 = vmatmul.msk.f32.gmra.mxu2 %vm176_vm1, %v216_v21 }
 0x16b   :  { %523 = vmatmul.msk.f32.gmra.mxu2 %vm176_vm1, %v217_v26 }
 0x173   :  { %524 = vmatmul.msk.f32.gmra.mxu2 %vm176_vm1, %v218_v32 }
 0x1ce   :  { %v303_v36 = vpop.f32.mrf.mxu2 }
 0x1cf   :  { %v327_v37 = vadd.f32 %v303_v36, %v189_v35 }
 0x1d1   :  { %335 = vst.msk [vmem:[#allocation2] sm:$0xff] %vm176_vm1, %v327_v37 }
 0x1d6   :  { %v306_v40 = vpop.f32.mrf.mxu2  ;;  %v321_v41 = vpop.f32.mrf.mxu3 }
 0x1d7   :  { %v328_v42 = vadd.f32 %v306_v40, %v190_v38  ;;  %v333_v43 = vadd.f32 %v321_v41, %v195_v39 }
 0x1d9   :  { %336 = vst.msk [vmem:[#allocation2 + $0x8] sm:$0xff] %vm176_vm1, %v328_v42 }
 0x1da   :  { %341 = vst.msk [vmem:[#allocation2 + $0x30] sm:$0xff] %vm176_vm1, %v333_v43 }
 0x1de   :  { %v309_v46 = vpop.f32.mrf.mxu2  ;;  %v324_v47 = vpop.f32.mrf.mxu3 }
 0x1df   :  { %v329_v48 = vadd.f32 %v309_v46, %v191_v44  ;;  %v334_v49 = vadd.f32 %v324_v47, %v196_v45 }
 0x1e1   :  { %337 = vst.msk [vmem:[#allocation2 + $0x10] sm:$0xff] %vm176_vm1, %v329_v48 }
 0x1e2   :  { %342 = vst.msk [vmem:[#allocation2 + $0x38] sm:$0xff] %vm176_vm1, %v334_v49 }
 0x1e6   :  { %v312_v51 = vpop.f32.mrf.mxu2 }
 0x1e7   :  { %v330_v27 = vadd.f32 %v312_v51, %v192_v50 }
 0x1e9   :  { %338 = vst.msk [vmem:[#allocation2 + $0x18] sm:$0xff] %vm176_vm1, %v330_v27 }
 0x1ee   :  { %v315_v52 = vpop.f32.mrf.mxu2 }
 0x1ef   :  { %v331_v53 = vadd.f32 %v315_v52, %v193_v17 }
 0x1f1   :  { %339 = vst.msk [vmem:[#allocation2 + $0x20] sm:$0xff] %vm176_vm1, %v331_v53 }
 0x1f6   :  { %v318_v56 = vpop.f32.mrf.mxu2 }
 0x1f7   :  { %v332_v57 = vadd.f32 %v318_v56, %v194_v54 }
 0x1f9   :  { %340 = vst.msk [vmem:[#allocation2 + $0x28] sm:$0xff] %vm176_vm1, %v332_v57 }
 0x1fa   :  { %444 = dma.vmem_to_hbm [thread:$0]  %s437_s5, 1024, %s439_s20, [#allocation3], %s671_s21, %s671_s21, %s672_s22  }
 0x1fb   :  { %659 = dma.done.wait [#allocation3], 1024  }
 0x1fc   :  { %660 = vsyncadd [#allocation3], 4294966272 }
 0x1fd   :  { %661 = dma.done.wait [#allocation5], 32  }
 0x1fe   :  { %662 = vsyncadd [#allocation5], 4294967264 }
 0x1ff   :  { %663 = dma.done.wait [#allocation8], 16  }
 0x200   :  { %664 = vsyncadd [#allocation8], 4294967280 }
 0x201   :  { %494 = vsyncpa [#allocation3], 1 }
 0x202   :  { %495 = vsyncpa [#allocation5], 1 }
 0x203   :  { %496 = vsyncpa [#allocation8], 1 }

</bundles_post_ra>
